<compile_context>
chip_gen: v7x
topology: tpu7x:2x2x1
jax: 0.10.0
libtpu: 0.0.40
codegen_flags: <defaults>
</compile_context>

<pallas_src>
import functools

import jax
import jax.numpy as jnp
from jax import lax
from jax.experimental import pallas as pl
from jax.experimental.pallas import tpu as pltpu


def _ls_ce_kernel(logits_ref, tgt_ref, out_ref, *, epsilon, n_rows, tile_n,
                  mask_rows):
    """One grid step: partial sum of -targets_smooth * log_softmax(logits)
    over a (tile_n, C) row-tile, written to this tile's (1,1,1) output slot."""
    x = logits_ref[...].astype(jnp.float32)                  # (TN, C) f32 math
    num_classes = x.shape[-1]

    # Numerically-stable log-sum-exp per row.
    m = jnp.max(x, axis=-1, keepdims=True)                    # (TN, 1)
    lse = jnp.log(jnp.sum(jnp.exp(x - m), axis=-1, keepdims=True)) + m
    sum_x = jnp.sum(x, axis=-1, keepdims=True)                # (TN, 1)

    # Logit at the target class: (1, C) lane-iota broadcast against (TN, 1)
    # targets (no full-width iota materialized per step).
    tgt = tgt_ref[...]                                        # (TN, 1) int32
    col = lax.broadcasted_iota(jnp.int32, (1, num_classes), 1)
    x_t = jnp.sum(jnp.where(col == tgt, x, 0.0), axis=-1, keepdims=True)

    # sum_c -[(1-eps)*onehot + eps/C] * logp ==
    #   (1-eps)*(lse - x_t) + (eps/C)*(C*lse - sum_x)
    row_loss = (1.0 - epsilon) * (lse - x_t) + (epsilon / num_classes) * (
        num_classes * lse - sum_x)                            # (TN, 1)

    if mask_rows:
        # Only emitted (statically) when N % tile_n != 0.  Garbage in the
        # padded rows of the final tile stays confined per-row and is thrown
        # away by this select.  Do NOT replace with multiplicative masking:
        # NaN/Inf from garbage rows would propagate.
        i = pl.program_id(0)
        row = i * tile_n + lax.broadcasted_iota(jnp.int32, (tile_n, 1), 0)
        row_loss = jnp.where(row < n_rows, row_loss, 0.0)

    out_ref[...] = jnp.sum(row_loss).reshape(1, 1, 1)


def _vmem_capacity_bytes():
    """Best-effort per-core VMEM capacity; conservative 64 MiB fallback."""
    try:
        return int(pltpu.get_tpu_info().vmem_capacity_bytes)
    except Exception:
        pass
    try:
        kind = jax.devices()[0].device_kind.lower()
        if ("v4" in kind) or ("v5" in kind) or ("v6" in kind):
            return 128 << 20
    except Exception:
        pass
    return 64 << 20


def label_smoothing_cross_entropy(logits, targets, epsilon=0.1,
                                  reduction="mean", tile_n=None):
    """Matches PyTorch LabelSmoothingCrossEntropy forward.

    reduction='mean' -> loss.mean() over all N*C elements (as in the module),
    reduction='sum'  -> loss.sum().
    """
    N, C = logits.shape
    itemsize = jnp.dtype(logits.dtype).itemsize

    vmem_cap = _vmem_capacity_bytes()
    if vmem_cap <= (64 << 20):            # v7x-class: 64 MiB VMEM / TensorCore
        target_block_bytes = 4 << 20
        vmem_limit_cap = 46 << 20         # leave headroom for compiler scratch
    else:                                  # v5e / v6e: 128 MiB VMEM
        target_block_bytes = 8 << 20
        vmem_limit_cap = 100 << 20

    if tile_n is None:
        tile_n = max(8, (target_block_bytes // (C * itemsize)) // 8 * 8)
    # Never exceed the (8-padded) batch; keep a multiple of 8.
    tile_n = min(int(tile_n), max(8, pl.cdiv(N, 8) * 8))
    tile_n = max(8, (tile_n // 8) * 8)

    def vmem_needed(tn):
        logits_block = tn * C * itemsize         # per input buffer
        targets_block = tn * 128 * 4             # (tn,1) int32 lane-pads to 128
        f32_work = tn * C * 4                    # full-width f32 temporaries
        return 2 * logits_block + 2 * targets_block + 6 * f32_work + (2 << 20)

    # Shrink the tile until the double-buffered working set fits the budget.
    while tile_n > 8 and vmem_needed(tile_n) > vmem_limit_cap:
        tile_n = max(8, ((tile_n // 2) // 8) * 8)
    # TODO(synk): for vocab-scale C on v7x (64 MiB VMEM), add a C-axis grid
    # dimension with an online/streaming LSE so VMEM is bounded independent of C.

    num_tiles = pl.cdiv(N, tile_n)
    targets2d = targets.astype(jnp.int32).reshape(N, 1)
    # TODO(synk): feed targets lane-major (1, tile_n) (or via SMEM prefetch) to
    # reclaim the (tile_n, 128)-int32 VMEM padding of this sublane-major block.

    vmem_limit = int(min(max(vmem_needed(tile_n), 32 << 20), vmem_limit_cap))

    kernel = functools.partial(
        _ls_ce_kernel, epsilon=float(epsilon), n_rows=N, tile_n=tile_n,
        mask_rows=(N % tile_n) != 0)

    cost = pl.CostEstimate(
        flops=6 * N * C,
        transcendentals=N * C,
        bytes_accessed=N * C * itemsize + N * 4 + num_tiles * 4,
    )

    partials = pl.pallas_call(
        kernel,
        out_shape=jax.ShapeDtypeStruct((num_tiles, 1, 1), jnp.float32),
        grid_spec=pltpu.PrefetchScalarGridSpec(
            num_scalar_prefetch=0,
            grid=(num_tiles,),
            in_specs=[
                pl.BlockSpec((tile_n, C), lambda i: (i, 0)),   # logits row-tile
                pl.BlockSpec((tile_n, 1), lambda i: (i, 0)),   # targets row-tile
            ],
            out_specs=pl.BlockSpec((1, 1, 1), lambda i: (i, 0, 0)),
        ),
        compiler_params=pltpu.CompilerParams(
            dimension_semantics=("parallel",),                 # v7x: 2 TCs usable
            vmem_limit_bytes=vmem_limit,
        ),
        cost_estimate=cost,
    )(logits, targets2d)

    total = jnp.sum(partials)
    if reduction == "mean":
        return total / jnp.float32(N * C)
    elif reduction == "sum":
        return total
    else:
        # TODO(synk): reduction='none' (per-row sum over classes) would need a
        # per-row output block; not implemented in this kernel.
        raise NotImplementedError("reduction must be 'mean' or 'sum'")


def _reference(logits, targets, epsilon=0.1):
    """Pure-JAX reference reproducing the PyTorch forward (reduction='mean')."""
    num_classes = logits.shape[-1]
    logp = jax.nn.log_softmax(logits.astype(jnp.float32), axis=-1)
    one_hot = jax.nn.one_hot(targets, num_classes, dtype=jnp.float32)
    smooth = (1.0 - epsilon) * one_hot + epsilon / num_classes
    return jnp.mean(-smooth * logp)


if __name__ == "__main__":
    key = jax.random.PRNGKey(0)
    k1, k2, k3, k4 = jax.random.split(key, 4)

    # Test 1: small f32, divisible batch.
    N, C = 16, 128
    logits = jax.random.normal(k1, (N, C), dtype=jnp.float32)
    targets = jax.random.randint(k2, (N,), 0, C, dtype=jnp.int32)
    loss = jax.block_until_ready(label_smoothing_cross_entropy(logits, targets, 0.1))
    ref = _reference(logits, targets, 0.1)
    assert jnp.allclose(loss, ref, rtol=1e-5, atol=1e-6), (loss, ref)

    # Test 2: non-divisible batch with explicit small tile -> partial-tile mask path.
    N2 = 24
    logits2 = jax.random.normal(k3, (N2, C), dtype=jnp.float32)
    targets2 = jax.random.randint(k4, (N2,), 0, C, dtype=jnp.int32)
    loss2 = jax.block_until_ready(
        label_smoothing_cross_entropy(logits2, targets2, 0.1, tile_n=16))
    ref2 = _reference(logits2, targets2, 0.1)
    assert jnp.allclose(loss2, ref2, rtol=1e-5, atol=1e-6), (loss2, ref2)

    # Test 3: bf16 logits accepted directly (half the HBM bytes), f32 math in-kernel.
    logits_bf16 = logits.astype(jnp.bfloat16)
    loss3 = jax.block_until_ready(
        label_smoothing_cross_entropy(logits_bf16, targets, 0.1))
    ref3 = _reference(logits_bf16, targets, 0.1)
    assert jnp.allclose(loss3, ref3, rtol=1e-5, atol=1e-5), (loss3, ref3)

    print("KERNEL_OK")
</pallas_src>

<mosaic_0001>
module attributes {stable_mosaic.version = 11 : i64} {
  func.func @_ls_ce_kernel(%arg0: i32, %arg1: memref<16x128xf32, #tpu.memory_space<vmem>>, %arg2: memref<16x1xi32, #tpu.memory_space<vmem>>, %arg3: memref<1x1x1xf32, #tpu.memory_space<vmem>>) attributes {dimension_semantics = [#tpu.dimension_semantics<parallel>], iteration_bounds = array<i64: 1>, scalar_prefetch = 0 : i64, scratch_operands = 0 : i64, tpu.core_type = #tpu.core_type<tc>, window_params = [{transform_indices = @transform_0, window_bounds = array<i64: 16, 128>}, {transform_indices = @transform_1, window_bounds = array<i64: 16, 1>}, {transform_indices = @transform_2, window_bounds = array<i64: 1, 1, 1>}]} {
    %c0 = arith.constant 0 : index
    %c0_0 = arith.constant 0 : index
    %0 = vector.load %arg1[%c0, %c0_0] : memref<16x128xf32, #tpu.memory_space<vmem>>, vector<16x128xf32>
    %cst = arith.constant dense<0xFF800000> : vector<16xf32>
    %1 = vector.multi_reduction <maximumf>, %0, %cst [1] : vector<16x128xf32> to vector<16xf32>
    %2 = vector.shape_cast %1 : vector<16xf32> to vector<16x1xf32>
    %3 = vector.broadcast %2 : vector<16x1xf32> to vector<16x128xf32>
    %4 = arith.subf %0, %3 : vector<16x128xf32>
    %5 = math.exp %4 : vector<16x128xf32>
    %cst_1 = arith.constant dense<0.000000e+00> : vector<16xf32>
    %6 = vector.multi_reduction <add>, %5, %cst_1 [1] : vector<16x128xf32> to vector<16xf32>
    %7 = vector.shape_cast %6 : vector<16xf32> to vector<16x1xf32>
    %8 = math.log %7 : vector<16x1xf32>
    %9 = arith.addf %8, %2 : vector<16x1xf32>
    %cst_2 = arith.constant dense<0.000000e+00> : vector<16xf32>
    %10 = vector.multi_reduction <add>, %0, %cst_2 [1] : vector<16x128xf32> to vector<16xf32>
    %11 = vector.shape_cast %10 : vector<16xf32> to vector<16x1xf32>
    %c0_3 = arith.constant 0 : index
    %c0_4 = arith.constant 0 : index
    %12 = vector.load %arg2[%c0_3, %c0_4] : memref<16x1xi32, #tpu.memory_space<vmem>>, vector<16x1xi32>
    %13 = tpu.iota {dimensions = array<i32: 1>} : vector<1x128xi32>
    %14 = vector.broadcast %13 : vector<1x128xi32> to vector<16x128xi32>
    %15 = vector.broadcast %12 : vector<16x1xi32> to vector<16x128xi32>
    %16 = arith.cmpi eq, %14, %15 : vector<16x128xi32>
    %cst_5 = arith.constant 0.000000e+00 : f32
    %17 = vector.broadcast %cst_5 : f32 to vector<16x128xf32>
    %18 = arith.select %16, %0, %17 : vector<16x128xi1>, vector<16x128xf32>
    %cst_6 = arith.constant dense<0.000000e+00> : vector<16xf32>
    %19 = vector.multi_reduction <add>, %18, %cst_6 [1] : vector<16x128xf32> to vector<16xf32>
    %20 = vector.shape_cast %19 : vector<16xf32> to vector<16x1xf32>
    %21 = arith.subf %9, %20 : vector<16x1xf32>
    %cst_7 = arith.constant 0.899999976 : f32
    %22 = vector.broadcast %cst_7 : f32 to vector<16x1xf32>
    %23 = arith.mulf %22, %21 : vector<16x1xf32>
    %cst_8 = arith.constant 1.280000e+02 : f32
    %24 = vector.broadcast %cst_8 : f32 to vector<16x1xf32>
    %25 = arith.mulf %24, %9 : vector<16x1xf32>
    %26 = arith.subf %25, %11 : vector<16x1xf32>
    %cst_9 = arith.constant 7.812500e-04 : f32
    %27 = vector.broadcast %cst_9 : f32 to vector<16x1xf32>
    %28 = arith.mulf %27, %26 : vector<16x1xf32>
    %29 = arith.addf %23, %28 : vector<16x1xf32>
    %30 = vector.shape_cast %29 : vector<16x1xf32> to vector<1x16x1xf32>
    %cst_10 = arith.constant dense<0.000000e+00> : vector<1xf32>
    %31 = vector.multi_reduction <add>, %30, %cst_10 [1, 2] : vector<1x16x1xf32> to vector<1xf32>
    %32 = vector.shape_cast %31 : vector<1xf32> to vector<1x1x1xf32>
    %33 = vector.extract %32[0, 0, 0] : f32 from vector<1x1x1xf32>
    %34 = vector.broadcast %33 : f32 to vector<1x1x1xf32>
    %c0_11 = arith.constant 0 : index
    %c0_12 = arith.constant 0 : index
    %c0_13 = arith.constant 0 : index
    %35 = vector.load %arg3[%c0_11, %c0_12, %c0_13] : memref<1x1x1xf32, #tpu.memory_space<vmem>>, vector<1x1x1xf32>
    tpu.vector_store %arg3[%c0_11, %c0_12, %c0_13], %34 {strides = array<i32>} : memref<1x1x1xf32, #tpu.memory_space<vmem>>, vector<1x1x1xf32>,
    return
  }
  func.func @transform_0(%arg0: i32) -> (i32, i32) {
    %c0_i32 = arith.constant 0 : i32
    %c0_i32_0 = arith.constant 0 : i32
    return %arg0, %c0_i32 : i32, i32
  }
  func.func @transform_1(%arg0: i32) -> (i32, i32) {
    %c0_i32 = arith.constant 0 : i32
    %c0_i32_0 = arith.constant 0 : i32
    return %arg0, %c0_i32 : i32, i32
  }
  func.func @transform_2(%arg0: i32) -> (i32, i32, i32) {
    %c0_i32 = arith.constant 0 : i32
    %c0_i32_0 = arith.constant 0 : i32
    %c0_i32_1 = arith.constant 0 : i32
    return %arg0, %c0_i32, %c0_i32_0 : i32, i32, i32
  }
}

</mosaic_0001>

<bundles_post_ra>
// kernel: tpu_custom_call.1
= control target key start
LH: loop header
LB: loop body
LE: loop exit
PB: predicated region body
PF: predicated region fallthrough
CT: control target
= control target key end

     0   :  { %v136_v2 = vmov 0   ;;  %s177_s0 = inlined_call_operand.vmem [shape: f32[16,128], index: 0, kind: input, shape index: {}]   ;;  %s178_s1 = inlined_call_operand.vmem [shape: s32[16,1], index: 1, kind: input, shape index: {}]   ;;  %s179_s2 = inlined_call_operand.hbm [shape: f32[1,1,1], index: 2, kind: output, shape index: {}]  }
   0x1   :  { %v12_v0 = vld [vmem:[%s177_s0] sm:$0xff]  ;;  %102 = vset.pattern.permute.xlu1 %v136_v2 }
   0x2   :  { %v38_v1 = vld [vmem:[%s178_s1] sm:$0xff]  ;;  %14 = vmax.xlane.f32.xlu0 %v12_v0 }
   0x3   :  { %7 = vsyncpa [#allocation3], 0  ;;  %v13_v3 = vld [vmem:[%s177_s0 + $0x8] sm:$0xff]  ;;  %43 = vperm.xlu1 %102, %v38_v1   ;;  %103 = vset.pattern.permute.xlu0 %v136_v2  ;;  %v40_v11 = vlaneseq  ;;  %vm68_vm2 = vcmask 7168   ;;  %s137_s0 = smov [#allocation2]   ;;  %vm82_vm3 = vcmask 0  }
   0x4   :  { %v39_v4 = vld [vmem:[%s178_s1 + $0x8] sm:$0xff]  ;;  %s90_s1 = sshll.u32 %s137_s0, 4  ;;  %s91_s1 = int_to_ptr.vmem [resolvable:$true] %s90_s1 }
   0x5   :  { %v41_v14 = vand.u32 127, %v40_v11  ;;  %s112_s18 = scalar_lea.vmem %s91_s1, 16  ;;  %s116_s19 = scalar_lea.vmem %s91_s1, 32 }
   0x6   :  { %16 = vmax.xlane.f32.xlu0 %v13_v3  ;;  %p113_p0 = scmp.ne.s32.totalorder %s91_s1, %s112_s18  ;;  %p117_p1 = scmp.lt.s32.totalorder %s91_s1, %s91_s1 }
   0x7   :  { %46 = vperm.xlu1 %102, %v39_v4   ;;  %p118_p2 = scmp.lt.s32.totalorder %s116_s19, %s112_s18 }
   0x9   :  { %p119_p3 = por %p118_p2, %p117_p1 }
   0xb   :  { %p120_p4 = pnand %p119_p3, %p113_p0 }
  0x82   :  { %v44_v13 = vpop.permute.xlu1 %43 }
  0x83   :  { %vm48_vm0 = vcmp.eq.s32.totalorder %v41_v14, %v44_v13 }
  0x84   :  { %v50_v17 = vsel %vm48_vm0, %v12_v0, 0.0 }
  0x86   :  { %v47_v16 = vpop.permute.xlu1 %46 }
  0x87   :  { %vm49_vm1 = vcmp.eq.s32.totalorder %v41_v14, %v47_v16 }
  0x88   :  { %v51_v18 = vsel %vm49_vm1, %v13_v3, 0.0 }
  0x8f   :  { %v15_v5 = vpop.xlane.xlu0 %14 }
  0x90   :  { %v18_v6 = vsub.f32 %v12_v0, %v15_v5 }
  0x92   :  { %v20_v7 = vmul.f32 1.442695, %v18_v6 }
  0x93   :  { %v17_v8 = vpop.xlane.xlu0 %16 }
  0x94   :  { %104 = vpow2.f32 %v20_v7  ;;  %v19_v9 = vsub.f32 %v13_v3, %v17_v8 }
  0x96   :  { %v22_v10 = vmul.f32 1.442695, %v19_v9 }
  0x98   :  { %106 = vpow2.f32 %v22_v10 }
  0x9e   :  { %v105_v12 = vpop.eup %104 }
  0x9f   :  { %24 = vadd.xlane.f32.xlu0 %v105_v12 }
  0xa2   :  { %v107_v15 = vpop.eup %106 }
  0xa3   :  { %26 = vadd.xlane.f32.xlu1 %v107_v15  ;;  %34 = vadd.xlane.f32.xlu0 %v12_v0 }
  0xa7   :  { %36 = vadd.xlane.f32.xlu0 %v13_v3 }
  0xab   :  { %52 = vadd.xlane.f32.xlu0 %v50_v17 }
  0xaf   :  { %54 = vadd.xlane.f32.xlu0 %v51_v18 }
 0x12c   :  { %v25_v19 = vpop.xlane.xlu0 %24 }
 0x12d   :  { %108 = vlog2.f32 %v25_v19 }
 0x130   :  { %v27_v20 = vpop.xlane.xlu1 %26  ;;  %v35_v21 = vpop.xlane.xlu0 %34 }
 0x131   :  { %110 = vlog2.f32 %v27_v20 }
 0x134   :  { %v37_v22 = vpop.xlane.xlu0 %36 }
 0x137   :  { %v109_v23 = vpop.eup %108 }
 0x138   :  { %v29_v24 = vmul.f32 0.6931472, %v109_v23  ;;  %v53_v25 = vpop.xlane.xlu0 %52 }
 0x13a   :  { %v32_v26 = vadd.f32 %v29_v24, %v15_v5 }
 0x13b   :  { %v111_v27 = vpop.eup %110 }
 0x13c   :  { %v31_v28 = vmul.f32 0.6931472, %v111_v27  ;;  %v60_v29 = vmul.f32 128.0, %v32_v26  ;;  %v56_v32 = vsub.f32 %v32_v26, %v53_v25  ;;  %v55_v33 = vpop.xlane.xlu0 %54 }
 0x13e   :  { %v62_v30 = vsub.f32 %v60_v29, %v35_v21  ;;  %v33_v31 = vadd.f32 %v31_v28, %v17_v8  ;;  %v58_v38 = vmul.f32 0.9, %v56_v32 }
 0x140   :  { %v64_v34 = vmul.f32 0.00078125, %v62_v30  ;;  %v61_v35 = vmul.f32 128.0, %v33_v31  ;;  %v57_v36 = vsub.f32 %v33_v31, %v55_v33 }
 0x142   :  { %v63_v37 = vsub.f32 %v61_v35, %v37_v22  ;;  %v66_v40 = vadd.f32 %v64_v34, %v58_v38  ;;  %v59_v41 = vmul.f32 0.9, %v57_v36 }
 0x144   :  { %v65_v39 = vmul.f32 0.00078125, %v63_v37  ;;  %v69_v43 = vsel %vm68_vm2, %v66_v40, 0.0 }
 0x146   :  { %v67_v42 = vadd.f32 %v65_v39, %v59_v41 }
 0x148   :  { %v70_v44 = vsel %vm68_vm2, %v67_v42, 0.0 }
 0x149   :  { %v71_v45 = vadd.f32 %v70_v44, %v69_v43 }
 0x14b   :  { %72 = vadd.xlane.f32.xlu0 %v71_v45 }
 0x1d8   :  { %v73_v46 = vpop.xlane.xlu0 %72 }
 0x1d9   :  { %v74_v47 = vrot.slane %v73_v46, 4 }
 0x1db   :  { %v75_v48 = vadd.f32 %v74_v47, %v73_v46 }
 0x1dd   :  { %v76_v49 = vrot.slane %v75_v48, 2 }
 0x1df   :  { %v77_v50 = vadd.f32 %v76_v49, %v75_v48 }
 0x1e1   :  { %v78_v51 = vrot.slane %v77_v50, 1 }
 0x1e3   :  { %v79_v52 = vadd.f32 %v78_v51, %v77_v50 }
 0x1e5   :  { %98 = vpush %v79_v52 }
 0x216   :  { %s99_s17 = spop %98 }
 0x217   :  { %v81_v53 = vstv %s99_s17 }
 0x218   :  { %83 = vst.msk [vmem:[#allocation2] sm:$0x1] %vm82_vm3, %v81_v53 }
 0x219   :  { %123 = shalt.err (!%p120_p4)
}
 0x21a   :  { %s124_s22 = scalar_lea.hbm %s179_s2, 16 }
 0x21b   :  { %p125_p5 = scmp.ne.s32.totalorder %s179_s2, %s124_s22  ;;  %p128_p6 = scmp.lt.u32.totalorder %s124_s22, %s179_s2 }
 0x21d   :  { %p130_p7 = pnand %p128_p6, %p125_p5 }
 0x21f   :  { %133 = shalt.err (!%p130_p7)
}
 0x220   :  { %93 = dma.vmem_to_hbm [thread:$0]  %s91_s1, 16, %s179_s2, [#allocation3]  }
 0x221   :  { %134 = dma.done.wait [#allocation3], 16  }
 0x222   :  { %135 = vsyncadd [#allocation3], 4294967280 }
 0x223   :  { %97 = vsyncpa [#allocation3], 1 }

</bundles_post_ra>
